<compile_context>
chip_gen: v7x
topology: tpu7x:2x2x1
jax: 0.10.0
libtpu: 0.0.40
codegen_flags: <defaults>
</compile_context>

<pallas_src>
import jax
import jax.numpy as jnp
from jax.experimental import pallas as pl
from jax.experimental.pallas import tpu as pltpu


_VMEM_LIMIT_BYTES = 48 * 1024 * 1024  # > 16/32 MiB defaults, < 64 MiB v7x physical


def _pick_tile(dim, target):
    """Largest multiple of 128 that divides `dim` and is <= target (else dim)."""
    if dim % 128 != 0:
        return dim
    t = min(target, dim)
    t -= t % 128
    while dim % t != 0:
        t -= 128
    return t


# --------------------------------------------------------------------------
# Kernel 1: gradient step   r = x - lam * (x @ PhiTPhi) + lam * PhiTb
# grid = (N // tn, N // tk)   j = output columns (parallel), k = contraction
# --------------------------------------------------------------------------
def _grad_step_kernel(lam_ref, xk_ref, phitphi_ref, xj_ref, phitb_ref,
                      r_ref, acc_ref):
    k = pl.program_id(1)

    @pl.when(k == 0)
    def _():
        acc_ref[...] = jnp.zeros_like(acc_ref)

    acc_ref[...] += jnp.dot(
        xk_ref[...].astype(phitphi_ref.dtype), phitphi_ref[...],
        preferred_element_type=jnp.float32)

    @pl.when(k == pl.num_programs(1) - 1)
    def _():
        lam = lam_ref[0, 0]
        r_ref[...] = xj_ref[...] - lam * acc_ref[...] + lam * phitb_ref[...]


# --------------------------------------------------------------------------
# Kernel 2: transform -> soft-threshold -> (fused) inverse transforms
#   x_forward = r @ W^T            [B, D]
#   x_soft    = soft(x_forward)    [B, D]
#   [x_pred ; x_est] = [x_soft ; x_forward] @ Winv^T   (one MXU stream)
#   symloss   = x_est - r
# grid = (N // tn2,)  streaming Winv^T column tiles; W^T and r stay resident.
# --------------------------------------------------------------------------
def _transform_kernel(thr_ref, r_full_ref, wt_ref, winvt_ref, rj_ref,
                      xpred_ref, sym_ref, stacked_ref):
    j = pl.program_id(0)
    b = rj_ref.shape[0]

    @pl.when(j == 0)
    def _():
        thr = thr_ref[0, 0]
        x_forward = jnp.dot(
            r_full_ref[...].astype(wt_ref.dtype), wt_ref[...],
            preferred_element_type=jnp.float32)                      # [B, D]
        x_soft = jnp.sign(x_forward) * jnp.maximum(jnp.abs(x_forward) - thr, 0.0)
        stacked_ref[0:b, :] = x_soft
        stacked_ref[b:2 * b, :] = x_forward

    out2 = jnp.dot(
        stacked_ref[...].astype(winvt_ref.dtype), winvt_ref[...],
        preferred_element_type=jnp.float32)                          # [2B, tn]
    xpred_ref[...] = out2[:b, :]
    sym_ref[...] = out2[b:, :] - rj_ref[...]


def basic_block(x, phitphi, phitb, lambda_step, soft_thr, W, Winv,
                *, weights_dtype=jnp.float32, tile_n=512, tile_k=512):
    B, N = x.shape
    D = W.shape[0]
    assert W.shape == (D, N) and Winv.shape == (N, D)
    assert phitphi.shape == (N, N) and phitb.shape == (B, N)

    x = x.astype(jnp.float32)
    phitb = phitb.astype(jnp.float32)
    # One-time layout plumbing (outside kernels): contraction dim leading.
    phitphi_c = phitphi.astype(weights_dtype)        # [N, N]
    wt = jnp.transpose(W).astype(weights_dtype)      # [N, D]
    winvt = jnp.transpose(Winv).astype(weights_dtype)  # [D, N]

    lam = jnp.asarray(lambda_step, jnp.float32).reshape(1, 1)
    thr = jnp.asarray(soft_thr, jnp.float32).reshape(1, 1)

    tn = _pick_tile(N, tile_n)
    tk = _pick_tile(N, tile_k)
    tn2 = _pick_tile(N, tile_n)

    smem = pl.BlockSpec(memory_space=pltpu.MemorySpace.SMEM)
    wbytes = jnp.dtype(weights_dtype).itemsize

    # ---- Kernel 1: gradient step (tiled, pipelined PhiTPhi stream) ----
    r = pl.pallas_call(
        _grad_step_kernel,
        out_shape=jax.ShapeDtypeStruct((B, N), jnp.float32),
        grid_spec=pltpu.PrefetchScalarGridSpec(
            num_scalar_prefetch=0,
            grid=(N // tn, N // tk),
            in_specs=[
                smem,                                              # lambda_step
                pl.BlockSpec((B, tk), lambda j, k: (0, k)),        # x  (LHS, by k)
                pl.BlockSpec((tk, tn), lambda j, k: (k, j)),       # PhiTPhi tile
                pl.BlockSpec((B, tn), lambda j, k: (0, j)),        # x  (finalize, by j)
                pl.BlockSpec((B, tn), lambda j, k: (0, j)),        # PhiTb
            ],
            out_specs=pl.BlockSpec((B, tn), lambda j, k: (0, j)),
            scratch_shapes=[pltpu.VMEM((B, tn), jnp.float32)],
        ),
        compiler_params=pltpu.CompilerParams(
            dimension_semantics=("parallel", "arbitrary"),
            vmem_limit_bytes=_VMEM_LIMIT_BYTES),
        cost_estimate=pl.CostEstimate(
            flops=2 * B * N * N,
            transcendentals=0,
            bytes_accessed=wbytes * N * N + 4 * 4 * B * N),
    )(lam, x, phitphi_c, x, phitb)

    # ---- Kernel 2: transform + soft-threshold + fused inverse transforms ----
    x_pred, symloss = pl.pallas_call(
        _transform_kernel,
        out_shape=(jax.ShapeDtypeStruct((B, N), jnp.float32),
                   jax.ShapeDtypeStruct((B, N), jnp.float32)),
        grid_spec=pltpu.PrefetchScalarGridSpec(
            num_scalar_prefetch=0,
            grid=(N // tn2,),
            in_specs=[
                smem,                                          # soft_thr
                pl.BlockSpec((B, N), lambda j: (0, 0)),        # r (resident)
                pl.BlockSpec((N, D), lambda j: (0, 0)),        # W^T (resident)
                pl.BlockSpec((D, tn2), lambda j: (0, j)),      # Winv^T (streamed)
                pl.BlockSpec((B, tn2), lambda j: (0, j)),      # r tile (symloss)
            ],
            out_specs=(pl.BlockSpec((B, tn2), lambda j: (0, j)),
                       pl.BlockSpec((B, tn2), lambda j: (0, j))),
            scratch_shapes=[pltpu.VMEM((2 * B, D), jnp.float32)],
        ),
        compiler_params=pltpu.CompilerParams(
            # "arbitrary": the j==0-computed scratch is reused by later steps,
            # so this axis must not be sharded across cores.
            dimension_semantics=("arbitrary",),
            vmem_limit_bytes=_VMEM_LIMIT_BYTES),
        cost_estimate=pl.CostEstimate(
            flops=2 * B * N * D + 2 * (2 * B) * D * N,
            transcendentals=0,
            bytes_accessed=wbytes * 2 * N * D + 4 * (5 * B * N + 2 * B * D)),
    )(thr, r, wt, winvt, r)

    return x_pred, symloss


def basic_block_ref(x, phitphi, phitb, lambda_step, soft_thr, W, Winv):
    x = x - lambda_step * (x @ phitphi)
    x = x + lambda_step * phitb
    x_input = x
    x_forward = x_input @ W.T
    x_soft = jnp.sign(x_forward) * jnp.maximum(jnp.abs(x_forward) - soft_thr, 0.0)
    x_pred = x_soft @ Winv.T
    x_est = x_forward @ Winv.T
    return x_pred, x_est - x_input


if __name__ == "__main__":
    # Small stand-in shapes (original module: N=4096, D=dictionary_size).
    B, N, D = 8, 256, 512

    key = jax.random.PRNGKey(0)
    k1, k2, k3, k4 = jax.random.split(key, 4)

    x = jax.random.normal(k1, (B, N), jnp.float32)
    Phi = jax.random.normal(k2, (64, N), jnp.float32) / jnp.sqrt(N)
    phitphi = Phi.T @ Phi                       # [N, N]
    phitb = (x @ Phi.T) @ Phi                   # [B, N]

    # Deterministic "dictionary" parameters (stand-in for DCT dictionary).
    W = jax.random.normal(k3, (D, N), jnp.float32) / jnp.sqrt(N)     # transform_matrix
    Winv = jax.random.normal(k4, (N, D), jnp.float32) / jnp.sqrt(D)  # inverse_transform_matrix
    lambda_step = 0.5
    soft_thr = 0.01

    # Small tiles so the demo actually exercises the multi-step grid
    # (accumulator init/finalize over k, Winv^T streaming over j).
    x_pred, symloss = basic_block(x, phitphi, phitb, lambda_step, soft_thr,
                                  W, Winv, tile_n=128, tile_k=128)
    jax.block_until_ready((x_pred, symloss))

    x_pred_ref, symloss_ref = basic_block_ref(x, phitphi, phitb, lambda_step,
                                              soft_thr, W, Winv)
    assert jnp.allclose(x_pred, x_pred_ref, atol=1e-3, rtol=1e-3)
    assert jnp.allclose(symloss, symloss_ref, atol=1e-3, rtol=1e-3)

    print("KERNEL_OK")
</pallas_src>

<mosaic_0001>
module attributes {stable_mosaic.version = 11 : i64} {
  func.func @_grad_step_kernel(%arg0: i32, %arg1: i32, %arg2: memref<1x1xf32, #tpu.memory_space<smem>>, %arg3: memref<8x128xf32, #tpu.memory_space<vmem>>, %arg4: memref<128x128xf32, #tpu.memory_space<vmem>>, %arg5: memref<8x128xf32, #tpu.memory_space<vmem>>, %arg6: memref<8x128xf32, #tpu.memory_space<vmem>>, %arg7: memref<8x128xf32, #tpu.memory_space<vmem>>, %arg8: memref<8x128xf32, #tpu.memory_space<vmem>>) attributes {dimension_semantics = [#tpu.dimension_semantics<parallel>, #tpu.dimension_semantics<arbitrary>], iteration_bounds = array<i64: 2, 2>, scalar_prefetch = 0 : i64, scratch_operands = 1 : i64, tpu.core_type = #tpu.core_type<tc>, window_params = [{transform_indices = @transform_0, window_bounds = array<i64: 1, 1>}, {transform_indices = @transform_1, window_bounds = array<i64: 8, 128>}, {transform_indices = @transform_2, window_bounds = array<i64: 128, 128>}, {transform_indices = @transform_3, window_bounds = array<i64: 8, 128>}, {transform_indices = @transform_4, window_bounds = array<i64: 8, 128>}, {transform_indices = @transform_5, window_bounds = array<i64: 8, 128>}]} {
    %c0_i32 = arith.constant 0 : i32
    %0 = arith.cmpi eq, %arg1, %c0_i32 : i32
    %1 = arith.extui %0 : i1 to i32
    %c0_i32_0 = arith.constant 0 : i32
    %2 = arith.cmpi ne, %1, %c0_i32_0 : i32
    scf.if %2 {
      %cst_9 = arith.constant 0.000000e+00 : f32
      %12 = vector.broadcast %cst_9 : f32 to vector<8x128xf32>
      %c0_10 = arith.constant 0 : index
      %c0_11 = arith.constant 0 : index
      %13 = vector.load %arg8[%c0_10, %c0_11] : memref<8x128xf32, #tpu.memory_space<vmem>>, vector<8x128xf32>
      tpu.vector_store %arg8[%c0_10, %c0_11], %12 {strides = array<i32>} : memref<8x128xf32, #tpu.memory_space<vmem>>, vector<8x128xf32>,
    } else {
    }
    %c0 = arith.constant 0 : index
    %c0_1 = arith.constant 0 : index
    %3 = vector.load %arg8[%c0, %c0_1] : memref<8x128xf32, #tpu.memory_space<vmem>>, vector<8x128xf32>
    %c0_2 = arith.constant 0 : index
    %c0_3 = arith.constant 0 : index
    %4 = vector.load %arg3[%c0_2, %c0_3] : memref<8x128xf32, #tpu.memory_space<vmem>>, vector<8x128xf32>
    %c0_4 = arith.constant 0 : index
    %c0_5 = arith.constant 0 : index
    %5 = vector.load %arg4[%c0_4, %c0_5] : memref<128x128xf32, #tpu.memory_space<vmem>>, vector<128x128xf32>
    %cst = arith.constant dense<0.000000e+00> : vector<8x128xf32>
    %6 = tpu.matmul %4, %5, %cst {dimension_numbers = #tpu.dot_dimension_numbers<[1], [0], [0], [1], [0, 0, 1, 1], [], []>} : vector<8x128xf32>, vector<128x128xf32>, vector<8x128xf32> -> vector<8x128xf32>
    %7 = arith.addf %3, %6 : vector<8x128xf32>
    %c0_6 = arith.constant 0 : index
    %c0_7 = arith.constant 0 : index
    %8 = vector.load %arg8[%c0_6, %c0_7] : memref<8x128xf32, #tpu.memory_space<vmem>>, vector<8x128xf32>
    tpu.vector_store %arg8[%c0_6, %c0_7], %7 {strides = array<i32>} : memref<8x128xf32, #tpu.memory_space<vmem>>, vector<8x128xf32>,
    %c1_i32 = arith.constant 1 : i32
    %9 = arith.cmpi eq, %arg1, %c1_i32 : i32
    %10 = arith.extui %9 : i1 to i32
    %c0_i32_8 = arith.constant 0 : i32
    %11 = arith.cmpi ne, %10, %c0_i32_8 : i32
    scf.if %11 {
      %c0_9 = arith.constant 0 : index
      %c0_10 = arith.constant 0 : index
      %12 = memref.load %arg2[%c0_9, %c0_10] : memref<1x1xf32, #tpu.memory_space<smem>>
      %c0_11 = arith.constant 0 : index
      %c0_12 = arith.constant 0 : index
      %13 = vector.load %arg5[%c0_11, %c0_12] : memref<8x128xf32, #tpu.memory_space<vmem>>, vector<8x128xf32>
      %c0_13 = arith.constant 0 : index
      %c0_14 = arith.constant 0 : index
      %14 = vector.load %arg8[%c0_13, %c0_14] : memref<8x128xf32, #tpu.memory_space<vmem>>, vector<8x128xf32>
      %15 = vector.broadcast %12 : f32 to vector<8x128xf32>
      %16 = arith.mulf %15, %14 : vector<8x128xf32>
      %17 = arith.subf %13, %16 : vector<8x128xf32>
      %c0_15 = arith.constant 0 : index
      %c0_16 = arith.constant 0 : index
      %18 = vector.load %arg6[%c0_15, %c0_16] : memref<8x128xf32, #tpu.memory_space<vmem>>, vector<8x128xf32>
      %19 = vector.broadcast %12 : f32 to vector<8x128xf32>
      %20 = arith.mulf %19, %18 : vector<8x128xf32>
      %21 = arith.addf %17, %20 : vector<8x128xf32>
      %c0_17 = arith.constant 0 : index
      %c0_18 = arith.constant 0 : index
      %22 = vector.load %arg7[%c0_17, %c0_18] : memref<8x128xf32, #tpu.memory_space<vmem>>, vector<8x128xf32>
      tpu.vector_store %arg7[%c0_17, %c0_18], %21 {strides = array<i32>} : memref<8x128xf32, #tpu.memory_space<vmem>>, vector<8x128xf32>,
    } else {
    }
    return
  }
  func.func @transform_0(%arg0: i32, %arg1: i32) -> (i32, i32) {
    %c0_i32 = arith.constant 0 : i32
    %c0_i32_0 = arith.constant 0 : i32
    %c0_i32_1 = arith.constant 0 : i32
    return %c0_i32, %c0_i32_0 : i32, i32
  }
  func.func @transform_1(%arg0: i32, %arg1: i32) -> (i32, i32) {
    %c0_i32 = arith.constant 0 : i32
    %c0_i32_0 = arith.constant 0 : i32
    return %c0_i32, %arg1 : i32, i32
  }
  func.func @transform_2(%arg0: i32, %arg1: i32) -> (i32, i32) {
    %c0_i32 = arith.constant 0 : i32
    return %arg1, %arg0 : i32, i32
  }
  func.func @transform_3(%arg0: i32, %arg1: i32) -> (i32, i32) {
    %c0_i32 = arith.constant 0 : i32
    %c0_i32_0 = arith.constant 0 : i32
    return %c0_i32, %arg0 : i32, i32
  }
  func.func @transform_4(%arg0: i32, %arg1: i32) -> (i32, i32) {
    %c0_i32 = arith.constant 0 : i32
    %c0_i32_0 = arith.constant 0 : i32
    return %c0_i32, %arg0 : i32, i32
  }
  func.func @transform_5(%arg0: i32, %arg1: i32) -> (i32, i32) {
    %c0_i32 = arith.constant 0 : i32
    %c0_i32_0 = arith.constant 0 : i32
    return %c0_i32, %arg0 : i32, i32
  }
}

</mosaic_0001>

<bundles_post_ra>
// kernel: tpu_custom_call.1
= control target key start
LH: loop header
LB: loop body
LE: loop exit
PB: predicated region body
PF: predicated region fallthrough
CT: control target
= control target key end

     0   :  { %s1681_s0 = inlined_call_operand.<no memory space> [shape: f32[1,1], index: 0, kind: input, shape index: {}]   ;;  %s1682_s1 = inlined_call_operand.hbm [shape: f32[8,256], index: 1, kind: input, shape index: {}]   ;;  %s1683_s2 = inlined_call_operand.hbm [shape: f32[256,256], index: 2, kind: input, shape index: {}]   ;;  %s1684_s3 = inlined_call_operand.hbm [shape: f32[8,256], index: 3, kind: input, shape index: {}]   ;;  %s1685_s4 = inlined_call_operand.hbm [shape: f32[8,256], index: 4, kind: input, shape index: {}]   ;;  %s1686_s5 = inlined_call_operand.hbm [shape: f32[8,256], index: 5, kind: output, shape index: {}]  }
   0x1   :  { %1703 = sst [smem:[#allocation26_spill]] %s1682_s1 }
   0x2   :  { %1704 = sst [smem:[#allocation27_spill]] %s1683_s2 }
   0x3   :  { %1705 = sst [smem:[#allocation28_spill]] %s1684_s3 }
   0x4   :  { %1706 = sst [smem:[#allocation29_spill]] %s1686_s5 }
   0x5   :  { %10 = sst [smem:[#allocation3]] %s1681_s0 }
   0x6   :  { %11 = vsyncpa [#allocation5], 0 }
   0x7   :  { %13 = vsyncpa [#allocation5 + $0x1], 0 }
   0x8   :  { %14 = vsyncpa [#allocation8], 0 }
   0x9   :  { %16 = vsyncpa [#allocation8 + $0x1], 0 }
   0xa   :  { %17 = vsyncpa [#allocation11], 0 }
   0xb   :  { %19 = vsyncpa [#allocation11 + $0x1], 0 }
   0xc   :  { %20 = vsyncpa [#allocation6], 0 }
   0xd   :  { %22 = vsyncpa [#allocation6 + $0x1], 0  ;;  %s1217_s20 = smov 0   ;;  %s1219_s21 = smov 0  }
   0xe   :  { %s1221_s22 = smov 0   ;;  %s1223_s23 = smov 0  }
   0xf   :  { %s1225_s24 = smov 0   ;;  %s1227_s25 = smov 0  }
  0x10   :  { %s1229_s0 = smov 0   ;;  %s1231_s26 = smov 0  }
  0x11   :  { %s1233_s27 = smov 0   ;;  %s1235_s28 = smov 0  }
  0x12   :  { %s1237_s29 = smov 0   ;;  %s1239_s30 = smov 0  }
  0x13   :  { %s1241_s6 = smov 0   ;;  %s1243_s7 = smov 0  }
  0x14 LB: > { %1707 = sst [smem:[#allocation18_spill]] %s1134_s24  ;;  %p1695_p0 = scmp.eq.s32.totalorder %s1170_s7, 0  ;;  %s1170_s7 = sphi %s1243_s7, %s28_s7   ;;  %s1166_s6 = sphi %s1241_s6, %s1765_s6   ;;  %s1162_s30 = sphi %s1239_s30, %s1753_s30   ;;  %s1158_s29 = sphi %s1237_s29, %s1764_s29   ;;  %s1154_s28 = sphi %s1235_s28, %s1763_s28   ;;  %s1150_s27 = sphi %s1233_s27, %s1762_s27   ;;  %s1146_s26 = sphi %s1231_s26, %s1761_s26   ;;  %s1142_s0 = sphi %s1229_s0, %s1760_s0   ;;  %s1138_s25 = sphi %s1227_s25, %s1759_s25   ;;  %s1134_s24 = sphi %s1225_s24, %s1758_s24   ;;  %s1130_s23 = sphi %s1223_s23, %s1750_s23   ;;  %s1126_s22 = sphi %s1221_s22, %s1757_s22   ;;  %s1122_s21 = sphi %s1219_s21, %s1756_s21   ;;  %s1118_s20 = sphi %s1217_s20, %s1755_s20  }
  0x15   : > { %1708 = sst [smem:[#allocation19_spill]] %s1154_s28  ;;  %p103_p1 = scmp.ne.s32.totalorder %s1138_s25, %s1134_s24 }
  0x16   : > { %1709 = sst [smem:[#allocation20_spill]] %s1158_s29  ;;  %p1687_p4 = scmp.lt.s32.totalorder %s1170_s7, 4 }
  0x17   : > { %1710 = sst [smem:[#allocation21_spill]] %s1162_s30  ;;  %p105_p3 = por %p103_p1, %p1695_p0 }
  0x18   : > { %s232_s10 = sand.u32 1, %s1170_s7   ;;  %s234_s11 = sand.u32 1, %s1138_s25  }
  0x19   : > { %s647_s12 = sshll.u32 %s234_s11, 7  ;;  %s667_s13 = sshll.u32 %s1162_s30, 5 }
  0x1a   : > { %s242_s14 = sadd.s32 %s1166_s6, %s667_s13  ;;  %s236_s15 = scalar_lea.vmem [#allocation7], %s647_s12 }
  0x1b   : > { %s245_s16 = sshll.u32 %s236_s15, 4  ;;  %s650_s17 = sshll.u32 %s242_s14, 7  ;;  %s1301_s16 = int_to_ptr.vmem [resolvable:$true] %s245_s16 }
  0x1c   : > { %s1711_s2 = sld [smem:[#allocation27_spill]]  ;;  %p1310_p5 = pnand %p1687_p4, %p105_p3 }
  0x1d   : > { %s1314_s11 = scalar_lea.sflag [#allocation8], %s232_s10 }
  0x1e   : > { %p894_p7 = pneg %p1310_p5 }
  0x22   : > { %s1306_s8 = scalar_lea.hbm %s1711_s2, %s650_s17  ;;  %s897_s15 = scalar_lea.hbm %s1711_s2, 8192 }
  0x23   : > { %s892_s12 = scalar_lea.hbm %s1306_s8, 2048  ;;  %p898_p10 = scmp.lt.u32.totalorder %s1306_s8, %s1711_s2 }
  0x24   : > { %p893_p6 = scmp.ne.s32.totalorder %s1306_s8, %s892_s12  ;;  %p899_p11 = scmp.lt.u32.totalorder %s897_s15, %s892_s12 }
  0x25   : > { %p901_p13 = scmp.lt.u32.totalorder %s892_s12, %s1306_s8 }
  0x26   : > { %p895_p8 = pnand %p894_p7, %p893_p6  ;;  %p900_p12 = por %p899_p11, %p898_p10 }
  0x28   : > { %p896_p9 = pneg %p895_p8  ;;  %p902_p1 = por %p901_p13, %p900_p12 }
  0x2a   : > { %p903_p3 = pnand %p902_p1, %p896_p9 }
  0x2c   : > { %906 = shalt.err (!%p903_p3)
}
  0x2d   : > { %s907_s10 = scalar_lea.vmem %s1301_s16, 2048  ;;  %s1172_s19 = smov [#allocation7]  }
  0x2e   : > { %p908_p6 = scmp.ne.s32.totalorder %s1301_s16, %s907_s10  ;;  %s912_s13 = sshll.u32 %s1172_s19, 4  ;;  %s913_s13 = int_to_ptr.vmem [resolvable:$false] %s912_s13 }
  0x2f   : > { %s914_s14 = scalar_lea.vmem %s913_s13, 4096  ;;  %p915_p2 = scmp.lt.s32.totalorder %s1301_s16, %s913_s13 }
  0x30   : > { %p910_p8 = pnand %p908_p6, %p894_p7  ;;  %p916_p10 = scmp.lt.s32.totalorder %s914_s14, %s907_s10 }
  0x32   : > { %p911_p4 = pneg %p910_p8  ;;  %p917_p11 = por %p916_p10, %p915_p2 }
  0x34   : > { %p918_p12 = pnand %p917_p11, %p911_p4 }
  0x36   : > { %921 = shalt.err (!%p918_p12)
}
  0x37   : > { %s1173_s12 = smov 256   ;;  %s1174_s15 = smov 128  }
  0x38   : > { %s1175_s17 = smov 8   ;;  %p655_p2 = scmp.ge.s32.totalorder %s1170_s7, 1 }
  0x39   : > { %760 = dma.hbm_to_vmem [thread:$0]  (!%p1310_p5), %s1306_s8, 2048, %s1301_s16, %s1314_s11, %s1173_s12, %s1174_s15, %s1175_s17  }
  0x3a   : > { %p289_p4 = scmp.lt.s32.totalorder %s1170_s7, 5  ;;  %s1349_s10 = sadd.s32 4294967295, %s1170_s7  }
  0x3b   : > { %s37_s19 = sadd.s32 1, %s1162_s30  ;;  %s68_s13 = sadd.s32 1, %s1150_s27 }
  0x3c   : > { %p1344_p7 = pnand %p655_p2, %p289_p4  ;;  %p38_p9 = scmp.ge.s32.totalorder %s37_s19, 2 }
  0x3d   : > { %p75_p5 = scmp.ne.s32.totalorder %s1150_s27, %s1146_s26  ;;  %p81_p13 = scmp.ne.s32.totalorder %s1146_s26, %s1142_s0 }
  0x3e   : > { %s1713_s18 = scalar_select %p1344_p7, 1, 0 }
  0x3f   : > { %p1694_p1 = scmp.eq.s32.totalorder %s1349_s10, 0  ;;  %s1767_s19 = smov (%p38_p9, %s37_s19), 0 }
  0x40   : > { %1714 = sst [smem:[#allocation22_spill]] %s1767_s19  ;;  %s1715_s8 = sadd.s32 1, %s1166_s6 }
  0x41   : > { %s1769_s8 = smov (!%p38_p9, %s1715_s8), %s1166_s6  ;;  %s65_s9 = ssub.s32 %s1162_s30, %s1767_s19 }
  0x42   : > { %p1367_p3 = por %p1695_p0, %p75_p5  ;;  %p42_p6 = scmp.ge.s32.totalorder %s1769_s8, 2 }
  0x43   : > { %p66_p8 = scmp.eq.s32.totalorder %s65_s9, 0  ;;  %p1373_p10 = por %p1694_p1, %p81_p13 }
  0x44   : > { %p1718_p11 = scmp.ne.s32.totalorder %s1134_s24, %s1130_s23  ;;  %s1771_s8 = smov (%p42_p6, %s1769_s8), 0 }
  0x45   : > { %s1717_s0 = scalar_select %p1373_p10, 1, 0 }
  0x46   : > { %p1382_p12 = por %p1718_p11, %p1694_p1  ;;  %1721 = sst [smem:[#allocation24_spill]] %s1771_s8 }
  0x47   : > { %s1389_s12 = scalar_select %p66_p8, %s1150_s27, %s68_s13  }
  0x48   : > { %s1719_s14 = scalar_select %p1382_p12, 1, 0 }
  0x49   : > { %1722 = sst [smem:[#allocation25_spill]] %s1389_s12  ;;  %s1393_s15 = ssub.s32 %s1166_s6, %s1771_s8 }
  0x4a   : > { %1720 = sst [smem:[#allocation23_spill]] %s1719_s14  ;;  %s214_s17 = sand.u32 1, %s1150_s27  }
  0x4b   : > { %s93_s2 = sor.u32 %s1393_s15, %s65_s9  ;;  %s645_s19 = sshll.u32 %s214_s17, 3 }
  0x4c   : > { %p94_p2 = scmp.eq.s32.totalorder %s93_s2, 0  ;;  %s646_s5 = sshll.u32 %s1162_s30, 7 }
  0x4d   : > { %s1723_s29 = sadd.s32 1, %s1138_s25  ;;  %s1724_s1 = sld [smem:[#allocation26_spill]] }
  0x4e   : > { %s1401_s28 = scalar_select %p94_p2, %s1138_s25, %s1723_s29  }
  0x4f   : > { %s218_s13 = scalar_lea.vmem [#allocation4], %s645_s19  ;;  %p1725_p4 = scmp.lt.s32.totalorder %s1170_s7, 4 }
  0x50   : > { %s225_s8 = sshll.u32 %s218_s13, 4  ;;  %s215_s29 = scalar_lea.sflag [#allocation5], %s214_s17  ;;  %s1408_s8 = int_to_ptr.vmem [resolvable:$true] %s225_s8 }
  0x51   : > { %p1414_p9 = pnand %p1725_p4, %p1367_p3 }
  0x53   : > { %s1406_s14 = scalar_lea.hbm %s1724_s1, %s646_s5  ;;  %p924_p13 = pneg %p1414_p9 }
  0x54   : > { %s922_s24 = scalar_lea.hbm %s1406_s14, 128  ;;  %s927_s9 = scalar_lea.hbm %s1724_s1, 256 }
  0x55   : > { %p923_p5 = scmp.ne.s32.totalorder %s1406_s14, %s922_s24  ;;  %p928_p3 = scmp.lt.u32.totalorder %s1406_s14, %s1724_s1 }
  0x56   : > { %p929_p11 = scmp.lt.u32.totalorder %s927_s9, %s922_s24  ;;  %p931_p4 = scmp.lt.u32.totalorder %s922_s24, %s1406_s14 }
  0x57   : > { %p925_p6 = pnand %p924_p13, %p923_p5 }
  0x58   : > { %p930_p2 = por %p929_p11, %p928_p3 }
  0x59   : > { %p926_p8 = pneg %p925_p6 }
  0x5a   : > { %p932_p1 = por %p931_p4, %p930_p2 }
  0x5c   : > { %p933_p0 = pnand %p932_p1, %p926_p8 }
  0x5e   : > { %936 = shalt.err (!%p933_p0)
}
  0x5f   : > { %s937_s17 = scalar_lea.vmem %s1408_s8, 128  ;;  %s1176_s13 = smov [#allocation4]  }
  0x60   : > { %p938_p5 = scmp.ne.s32.totalorder %s1408_s8, %s937_s17  ;;  %s942_s5 = sshll.u32 %s1176_s13, 4  ;;  %s943_s5 = int_to_ptr.vmem [resolvable:$false] %s942_s5 }
  0x61   : > { %s944_s19 = scalar_lea.vmem %s943_s5, 256  ;;  %p945_p10 = scmp.lt.s32.totalorder %s1408_s8, %s943_s5 }
  0x62   : > { %p940_p6 = pnand %p938_p5, %p924_p13  ;;  %p946_p3 = scmp.lt.s32.totalorder %s944_s19, %s937_s17 }
  0x64   : > { %p941_p12 = pneg %p940_p6  ;;  %p947_p11 = por %p946_p3, %p945_p10 }
  0x66   : > { %p948_p2 = pnand %p947_p11, %p941_p12 }
  0x68   : > { %951 = shalt.err (!%p948_p2)
}
  0x69   : > { %757 = dma.hbm_to_vmem [thread:$0]  (!%p1414_p9), %s1406_s14, 128, %s1408_s8, %s215_s29  }
  0x6a   : > { %s642_s24 = sadd.s32 4294967294, %s1170_s7   ;;  %p120_p0 = scmp.eq.s32.totalorder %s1393_s15, 0 }
  0x6b   : > { %s122_s2 = sadd.s32 1, %s1126_s22  ;;  %p129_p1 = scmp.ne.s32.totalorder %s1126_s22, %s1122_s21 }
  0x6c   : > { %p135_p10 = scmp.ne.s32.totalorder %s1122_s21, %s1118_s20  ;;  %p1727_p12 = scmp.eq.s32.totalorder %s1170_s7, 0 }
  0x6d   : > { %s1451_s9 = scalar_select %p120_p0, %s1126_s22, %s122_s2  }
  0x6e   : > { %p131_p13 = por %p129_p1, %p1727_p12  ;;  %p1728_p8 = scmp.eq.s32.totalorder %s1349_s10, 0 }
  0x6f   : > { %p185_p5 = scmp.eq.s32.totalorder %s1349_s10, 3  ;;  %p191_p6 = scmp.eq.s32.totalorder %s642_s24, 3 }
  0x70   : > { %p1457_p4 = por %p135_p10, %p1728_p8  ;;  %s1698_s23 = sand.u32 1, %s1126_s22  }
  0x71   : > { %s1699_s8 = sshll.u32 %s1166_s6, 7  ;;  %p1464_p9 = por %p185_p5, %p129_p1 }
  0x72   : > { %s1729_s16 = scalar_select %p1457_p4, 1, 0 }
  0x73   : > { %s1730_s14 = scalar_select %p1464_p9, 1, 0 }
  0x74   : > { %p1468_p3 = por %p191_p6, %p135_p10  ;;  %s1474_s29 = sshll.u32 %s1698_s23, 3 }
  0x75   : > { %s1732_s3 = sld [smem:[#allocation28_spill]]  ;;  %p1733_p11 = scmp.lt.s32.totalorder %s1170_s7, 4 }
  0x76   : > { %s1731_s15 = scalar_select %p1468_p3, 1, 0 }
  0x77   : > { %p1485_p2 = pnand %p1733_p11, %p131_p13  ;;  %s259_s24 = scalar_lea.vmem [#allocation9], %s1474_s29 }
  0x78   : > { %s266_s2 = sshll.u32 %s259_s24, 4  ;;  %s267_s2 = int_to_ptr.vmem [resolvable:$true] %s266_s2 }
  0x79   : > { %p954_p1 = pneg %p1485_p2 }
  0x7b   : > { %s1481_s5 = scalar_lea.hbm %s1732_s3, %s1699_s8  ;;  %s957_s8 = scalar_lea.hbm %s1732_s3, 256 }
  0x7c   : > { %s952_s23 = scalar_lea.hbm %s1481_s5, 128  ;;  %p958_p13 = scmp.lt.u32.totalorder %s1481_s5, %s1732_s3 }
  0x7d   : > { %p953_p0 = scmp.ne.s32.totalorder %s1481_s5, %s952_s23  ;;  %p959_p8 = scmp.lt.u32.totalorder %s957_s8, %s952_s23 }
  0x7e   : > { %p961_p6 = scmp.lt.u32.totalorder %s952_s23, %s1481_s5 }
  0x7f   : > { %p955_p10 = pnand %p954_p1, %p953_p0  ;;  %p960_p5 = por %p959_p8, %p958_p13 }
  0x81   : > { %p956_p12 = pneg %p955_p10  ;;  %p962_p11 = por %p961_p6, %p960_p5 }
  0x83   : > { %p963_p3 = pnand %p962_p11, %p956_p12 }
  0x85   : > { %966 = shalt.err (!%p963_p3)
}
  0x86   : > { %s967_s24 = scalar_lea.vmem %s267_s2, 128  ;;  %s1177_s12 = smov [#allocation9]  }
  0x87   : > { %p968_p9 = scmp.ne.s32.totalorder %s267_s2, %s967_s24  ;;  %s972_s17 = sshll.u32 %s1177_s12, 4  ;;  %s973_s17 = int_to_ptr.vmem [resolvable:$false] %s972_s17 }
  0x88   : > { %s974_s13 = scalar_lea.vmem %s973_s17, 256  ;;  %p975_p4 = scmp.lt.s32.totalorder %s267_s2, %s973_s17 }
  0x89   : > { %p970_p0 = pnand %p968_p9, %p954_p1  ;;  %p976_p7 = scmp.lt.s32.totalorder %s974_s13, %s967_s24 }
  0x8b   : > { %p971_p10 = pneg %p970_p0  ;;  %p977_p8 = por %p976_p7, %p975_p4 }
  0x8d   : > { %p978_p13 = pnand %p977_p8, %p971_p10 }
  0x8f   : > { %981 = shalt.err (!%p978_p13)
}
  0x90   : > { %763 = dma.hbm_to_vmem [thread:$0]  (!%p1485_p2), %s1481_s5, 128, %s267_s2, %s1314_s11  }
  0x91   : > { %s1735_s1 = sshll.u32 %s1166_s6, 7  ;;  %s277_s8 = scalar_lea.vmem [#allocation10], %s1474_s29 }
  0x92   : > { %s1517_s12 = scalar_lea.hbm %s1685_s4, %s1735_s1  ;;  %s284_s24 = sshll.u32 %s277_s8, 4  ;;  %s285_s24 = int_to_ptr.vmem [resolvable:$true] %s284_s24 }
  0x93   : > { %s1736_s17 = sand.u32 1, %s1126_s22   ;;  %s982_s3 = scalar_lea.hbm %s1517_s12, 128 }
  0x94   : > { %s274_s13 = scalar_lea.sflag [#allocation11], %s1736_s17  ;;  %p983_p7 = scmp.ne.s32.totalorder %s1517_s12, %s982_s3 }
  0x95   : > { %s987_s2 = scalar_lea.hbm %s1685_s4, 256  ;;  %p988_p3 = scmp.lt.u32.totalorder %s1517_s12, %s1685_s4 }
  0x96   : > { %p985_p4 = pnand %p983_p7, %p954_p1  ;;  %p989_p12 = scmp.lt.u32.totalorder %s987_s2, %s982_s3 }
  0x97   : > { %p991_p6 = scmp.lt.u32.totalorder %s982_s3, %s1517_s12 }
  0x98   : > { %p986_p9 = pneg %p985_p4  ;;  %p990_p5 = por %p989_p12, %p988_p3 }
  0x9a   : > { %p992_p11 = por %p991_p6, %p990_p5 }
  0x9c   : > { %p993_p0 = pnand %p992_p11, %p986_p9 }
  0x9e   : > { %996 = shalt.err (!%p993_p0)
}
  0x9f   : > { %s997_s29 = scalar_lea.vmem %s285_s24, 128  ;;  %s1178_s23 = smov [#allocation10]  }
  0xa0   : > { %p998_p10 = scmp.ne.s32.totalorder %s285_s24, %s997_s29  ;;  %s1002_s8 = sshll.u32 %s1178_s23, 4  ;;  %s1003_s8 = int_to_ptr.vmem [resolvable:$false] %s1002_s8 }
  0xa1   : > { %s1004_s17 = scalar_lea.vmem %s1003_s8, 256  ;;  %p1005_p7 = scmp.lt.s32.totalorder %s285_s24, %s1003_s8 }
  0xa2   : > { %p1000_p8 = pnand %p998_p10, %p954_p1  ;;  %p1006_p4 = scmp.lt.s32.totalorder %s1004_s17, %s997_s29 }
  0xa4   : > { %p1001_p13 = pneg %p1000_p8  ;;  %p1007_p3 = por %p1006_p4, %p1005_p7 }
  0xa6   : > { %p1008_p12 = pnand %p1007_p3, %p1001_p13 }
  0xa8   : > { %1011 = shalt.err (!%p1008_p12)
}
  0xa9   : > { %766 = dma.hbm_to_vmem [thread:$0]  (!%p1485_p2), %s1517_s12, 128, %s285_s24, %s274_s13  }
  0xaa   : > { %p1737_p9 = scmp.ne.s32.totalorder %s1713_s18, 0 }
  0xab   : > { %s295_s3 = sand.u32 (!%p1737_p9), 1, %s1146_s26   ;;  %p1738_p1 = scmp.ne.s32.totalorder (!%p1737_p9), %s1717_s0, 0 }
  0xac   : > { %293 = sbr.rel (%p1737_p9) target bundleno = 501 (0x1f5), region = 40  ;;  %s1544_s11 = sshll.u32 (!%p1737_p9), %s295_s3, 3 }
  0xad   : > { %s296_s5 = scalar_lea.sflag (!%p1737_p9), [#allocation5], %s295_s3  ;;  %s299_s2 = scalar_lea.vmem (!%p1737_p9), [#allocation4], %s1544_s11 }
  0xb3   : > { %1097 = dma.done.wait (%p1738_p1), %s296_s5, 128  }
  0xb4   : > { %1099 = vsyncadd (%p1738_p1), %s296_s5, 4294967168  ;;  %s1739_s19 = sld [smem:[#allocation18_spill]]  ;;  %s1740_s1 = sld [smem:[#allocation23_spill]] }
  0xb5   : > { %s304_s12 = sand.u32 1, %s1349_s10  }
  0xb6   : > { %s305_s13 = scalar_lea.sflag [#allocation8], %s304_s12 }
  0xba   : > { %s306_s24 = sand.u32 1, %s1739_s19   ;;  %p1741_p2 = scmp.ne.s32.totalorder %s1740_s1, 0 }
  0xbb   : > { %s657_s18 = sshll.u32 %s306_s24, 7 }
  0xbc   : > { %s1553_s30 = scalar_lea.vmem [#allocation7], %s657_s18 }
  0xbd   : > { %1101 = dma.done.wait (%p1741_p2), %s305_s13, 2048  }
  0xbe   : > { %1103 = vsyncadd (%p1741_p2), %s305_s13, 4294965248  ;;  %s1560_s29 = sand.u32 1, %s1122_s21   ;;  %p1742_p5 = scmp.ne.s32.totalorder %s1729_s16, 0 }
  0xbf   : > { %s1563_s0 = sshll.u32 %s1560_s29, 3 }
  0xc0   : > { %s317_s23 = scalar_lea.vmem [#allocation9], %s1563_s0 }
  0xc1   : > { %1105 = dma.done.wait (%p1742_p5), %s305_s13, 128  }
  0xc2   : > { %1107 = vsyncadd (%p1742_p5), %s305_s13, 4294967168  ;;  %s323_s10 = scalar_lea.sflag [#allocation11], %s1560_s29  ;;  %s326_s8 = scalar_lea.vmem [#allocation10], %s1563_s0 }
  0xc3   : > { %1109 = dma.done.wait (%p1742_p5), %s323_s10, 128  }
  0xc4   : > { %1111 = vsyncadd (%p1742_p5), %s323_s10, 4294967168  ;;  %s367_s17 = scalar_lea.vmem [#allocation12], %s1563_s0  ;;  %s1743_s3 = sld [smem:[#allocation19_spill]] }
  0xca   : > { %p661_p6 = scmp.ne.s32.totalorder %s1743_s3, 0 }
  0xcb   : > { %v1179_v0 = vmov (!%p661_p6), 0.0  }
  0xcc   : > { %372 = sbr.rel (%p661_p6) target bundleno = 211 (0xd3), region = 60  ;;  %373 = vst [vmem:[#allocation2] sm:$0xff] (!%p661_p6), %v1179_v0 }
  0xd3 PF: > { %v376_v1 = vld [vmem:[%s1553_s30] sm:$0xff]  ;;  %v377_v2 = vld [vmem:[%s1553_s30 + $0x8] sm:$0xff]  ;;  %v378_v3 = vld [vmem:[%s1553_s30 + $0x10] sm:$0xff]  ;;  %v1180_v4 = vmov 0.0|0.0   ;;  %vm1181_vm0 = vmmov 0   ;;  %v1182_v7 = vmov 0.0  }
  0xd4   : > { %720 = vmatprep.subr.bf16.mxu0 %v1180_v4  ;;  %v721_v5 = vpack.c.bf16 %v377_v2, %v376_v1  ;;  %v379_v6 = vld [vmem:[%s1553_s30 + $0x18] sm:$0xff]  ;;  %717 = vmatprep.mubr.msk.f32.mxu0 %vm1181_vm0, %v1182_v7  ;;  %v380_v9 = vld [vmem:[%s1553_s30 + $0x20] sm:$0xff]  ;;  %v381_v10 = vld [vmem:[%s1553_s30 + $0x28] sm:$0xff]  ;;  %s1744_s16 = sld [smem:[#allocation19_spill]] }
  0xd5   : > { %v724_v8 = vpack.c.bf16 %v379_v6, %v378_v3  ;;  %v727_v11 = vpack.c.bf16 %v381_v10, %v380_v9  ;;  %v382_v12 = vld [vmem:[%s1553_s30 + $0x30] sm:$0xff]  ;;  %v383_v13 = vld [vmem:[%s1553_s30 + $0x38] sm:$0xff]  ;;  %v384_v15 = vld [vmem:[%s1553_s30 + $0x40] sm:$0xff] }
  0xd6   : > { %722 = vmatpush3.bf16.msra.mxu0 %v721_v5  ;;  %v730_v14 = vpack.c.bf16 %v383_v13, %v382_v12  ;;  %v385_v16 = vld [vmem:[%s1553_s30 + $0x48] sm:$0xff]  ;;  %v386_v18 = vld [vmem:[%s1553_s30 + $0x50] sm:$0xff]  ;;  %v387_v19 = vld [vmem:[%s1553_s30 + $0x58] sm:$0xff] }
  0xd7   : > { %723 = vmatprep.subr.bf16.mxu0 %v1180_v4  ;;  %v733_v17 = vpack.c.bf16 %v385_v16, %v384_v15  ;;  %v736_v20 = vpack.c.bf16 %v387_v19, %v386_v18  ;;  %v388_v21 = vld [vmem:[%s1553_s30 + $0x60] sm:$0xff]  ;;  %v389_v22 = vld [vmem:[%s1553_s30 + $0x68] sm:$0xff]  ;;  %v390_v24 = vld [vmem:[%s1553_s30 + $0x70] sm:$0xff] }
  0xd8   : > { %v739_v23 = vpack.c.bf16 %v389_v22, %v388_v21  ;;  %v391_v25 = vld [vmem:[%s1553_s30 + $0x78] sm:$0xff]  ;;  %v374_v28 = vld [vmem:[#allocation2] sm:$0xff] }
  0xd9   : > { %v742_v26 = vpack.c.bf16 %v391_v25, %v390_v24  ;;  %v375_v27 = vld [vmem:[%s299_s2] sm:$0xff] }
  0xda   : > { %725 = vmatpush3.bf16.msra.mxu0 %v724_v8  ;;  %p662_p11 = scmp.ne.s32.totalorder %s1744_s16, 1 }
  0xdb   : > { %726 = vmatprep.subr.bf16.mxu0 %v1180_v4  ;;  %s468_s5 = sld [smem:[#allocation3]] (!%p662_p11)  ;;  %v474_v33 = vld [vmem:[%s326_s8] sm:$0xff] (!%p662_p11)  ;;  %v469_v34 = vld [vmem:[%s317_s23] sm:$0xff] (!%p662_p11) }
  0xde   : > { %728 = vmatpush3.bf16.msra.mxu0 %v727_v11 }
  0xdf   : > { %729 = vmatprep.subr.bf16.mxu0 %v1180_v4 }
  0xe1   : > { %v471_v35 = vstv (!%p662_p11), %s468_s5 }
  0xe2   : > { %731 = vmatpush3.bf16.msra.mxu0 %v730_v14  ;;  %v475_v37 = vmul.f32 (!%p662_p11), %v474_v33, %v471_v35 }
  0xe3   : > { %732 = vmatprep.subr.bf16.mxu0 %v1180_v4 }
  0xe6   : > { %734 = vmatpush3.bf16.msra.mxu0 %v733_v17 }
  0xe7   : > { %735 = vmatprep.subr.bf16.mxu0 %v1180_v4 }
  0xea   : > { %737 = vmatpush3.bf16.msra.mxu0 %v736_v20 }
  0xeb   : > { %738 = vmatprep.subr.bf16.mxu0 %v1180_v4 }
  0xee   : > { %740 = vmatpush3.bf16.msra.mxu0 %v739_v23 }
  0xef   : > { %741 = vmatprep.subr.bf16.mxu0 %v1180_v4 }
  0xf2   : > { %743 = vmatpush3.bf16.msra.mxu0 %v742_v26 }
  0xf5   : > { %718 = vmatmul.mubr.f32.vlgmr.msra.gmra.mrb[0].mxu0 %v375_v27 }
 0x1c5   : > { %467 = sbr.rel (%p662_p11) target bundleno = 474 (0x1da), region = 64 }
 0x1c8   : > { %v458_v29 = vpop.f32.mrb[0].mxu0 }
 0x1c9   : > { %v462_v30 = vadd.f32 %v458_v29, %v374_v28  ;;  %v719_v31 = vpop.f32.mrb[1].mxu0 }
 0x1cb   : > { %463 = vst [vmem:[#allocation2] sm:$0xff] %v462_v30 }
 0x1d2   : > { %v470_v32 = vld [vmem:[#allocation2] sm:$0xff] }
 0x1d3   : > { %v472_v36 = vmul.f32 %v471_v35, %v470_v32 }
 0x1d5   : > { %v473_v38 = vsub.f32 %v469_v34, %v472_v36 }
 0x1d7   : > { %v476_v39 = vadd.f32 %v475_v37, %v473_v38 }
 0x1d9   : > { %477 = vst [vmem:[%s367_s17] sm:$0xff] %v476_v39 }
 0x1da PF: > { %s1745_s11 = sld [smem:[#allocation20_spill]]  ;;  %s1746_s12 = sld [smem:[#allocation29_spill]] }
 0x1db   : > { %s492_s18 = sshll.u32 %s367_s17, 4  ;;  %s479_s13 = scalar_lea.sflag [#allocation6], %s1560_s29  ;;  %s493_s18 = int_to_ptr.vmem [resolvable:$true] %s492_s18 }
 0x1dc   : > { %s1012_s30 = scalar_lea.vmem %s493_s18, 128  ;;  %p1747_p10 = scmp.ne.s32.totalorder %s1730_s14, 0 }
 0x1dd   : > { %p1013_p0 = scmp.ne.s32.totalorder %s493_s18, %s1012_s30  ;;  %s1183_s23 = smov [#allocation12]  }
 0x1de   : > { %s1016_s10 = sshll.u32 %s1183_s23, 4  ;;  %s1017_s10 = int_to_ptr.vmem [resolvable:$false] %s1016_s10 }
 0x1df   : > { %p1014_p8 = pnand %p1013_p0, %p1747_p10  ;;  %s1018_s8 = scalar_lea.vmem %s1017_s10, 256 }
 0x1e0   : > { %s664_s2 = sshll.u32 %s1745_s11, 7  ;;  %p1019_p7 = scmp.lt.s32.totalorder %s493_s18, %s1017_s10 }
 0x1e1   : > { %s1607_s24 = scalar_lea.hbm %s1746_s12, %s664_s2  ;;  %p1015_p13 = pneg %p1014_p8 }
 0x1e2   : > { %p1020_p4 = scmp.lt.s32.totalorder %s1018_s8, %s1012_s30 }
 0x1e4   : > { %p1021_p3 = por %p1020_p4, %p1019_p7 }
 0x1e6   : > { %p1022_p12 = pnand %p1021_p3, %p1015_p13 }
 0x1e8   : > { %1025 = shalt.err (!%p1022_p12)
}
 0x1e9   : > { %s1026_s29 = scalar_lea.hbm %s1607_s24, 128  ;;  %s1030_s3 = scalar_lea.hbm %s1746_s12, 256 }
 0x1ea   : > { %p1027_p9 = scmp.ne.s32.totalorder %s1607_s24, %s1026_s29  ;;  %p1031_p5 = scmp.lt.u32.totalorder %s1607_s24, %s1746_s12 }
 0x1eb   : > { %p1032_p6 = scmp.lt.u32.totalorder %s1030_s3, %s1026_s29  ;;  %p1034_p0 = scmp.lt.u32.totalorder %s1026_s29, %s1607_s24 }
 0x1ec   : > { %p1028_p1 = pnand %p1027_p9, %p1747_p10 }
 0x1ed   : > { %p1033_p11 = por %p1032_p6, %p1031_p5 }
 0x1ee   : > { %p1029_p2 = pneg %p1028_p1 }
 0x1ef   : > { %p1035_p8 = por %p1034_p0, %p1033_p11 }
 0x1f1   : > { %p1036_p13 = pnand %p1035_p8, %p1029_p2 }
 0x1f3   : > { %1039 = shalt.err (!%p1036_p13)
}
 0x1f4   : > { %752 = dma.vmem_to_hbm [thread:$0]  (%p1747_p10), %s493_s18, 128, %s1607_s24, %s479_s13  }
 0x1f5 PF: > { %p772_p7 = scmp.ge.s32.totalorder %s1170_s7, 2  ;;  %s504_s11 = sand.u32 1, %s1118_s20  }
 0x1f6   : > { %p1748_p4 = scmp.ne.s32.totalorder %s1731_s15, 0  ;;  %s505_s2 = scalar_lea.sflag [#allocation6], %s504_s11 }
 0x1f8   : > { %p768_p3 = pnand %p772_p7, %p1748_p4 }
 0x1fa   : > { %1113 = dma.done.wait (!%p768_p3), %s505_s2, 128  }
 0x1fb   : > { %1115 = vsyncadd (!%p768_p3), %s505_s2, 4294967168  ;;  %s28_s7 = sadd.s32 1, %s1170_s7   ;;  %s1750_s23 = sld [smem:[#allocation18_spill]] }
 0x1fc   : > { %p1634_p12 = scmp.ge.s32.totalorder %s28_s7, 6   ;;  %s1751_s14 = sld [smem:[#allocation25_spill]] }
 0x1fd   : > { %s1752_s15 = sld [smem:[#allocation21_spill]]  ;;  %s1753_s30 = sld [smem:[#allocation22_spill]] }
 0x1fe   : > { %s1754_s1 = sld [smem:[#allocation24_spill]]  ;;  %s1755_s20 = smov %s1122_s21 }
 0x1ff   : > { %s1756_s21 = smov %s1126_s22  ;;  %s1757_s22 = smov %s1451_s9 }
 0x200   : > { %s1758_s24 = smov %s1138_s25  ;;  %s1759_s25 = smov %s1401_s28 }
 0x201   : > { %s1760_s0 = smov %s1146_s26  ;;  %s1761_s26 = smov %s1150_s27 }
 0x202   : > { %s1762_s27 = smov %s1751_s14  ;;  %s1764_s29 = smov %s1166_s6 }
 0x203   : > { %s1763_s28 = smov %s1752_s15  ;;  %27 = sbr.rel (!%p1634_p12) target bundleno = 20 (0x14), region = 130 }
 0x204   : > { %s1765_s6 = smov %s1754_s1 }
 0x20a   :  { %510 = vsyncpa [#allocation5], 1 }
 0x20b   :  { %512 = vsyncpa [#allocation5 + $0x1], 1 }
 0x20c   :  { %513 = vsyncpa [#allocation8], 1 }
 0x20d   :  { %515 = vsyncpa [#allocation8 + $0x1], 1 }
 0x20e   :  { %516 = vsyncpa [#allocation11], 1 }
 0x20f   :  { %518 = vsyncpa [#allocation11 + $0x1], 1 }
 0x210   :  { %519 = vsyncpa [#allocation6], 1 }
 0x211   :  { %521 = vsyncpa [#allocation6 + $0x1], 1 }

</bundles_post_ra>
